<compile_context>
chip_gen: v7x
topology: tpu7x:2x2x1
jax: 0.10.0
libtpu: 0.0.40
codegen_flags: <defaults>
</compile_context>

<pallas_src>
import functools

import jax
import jax.numpy as jnp
from jax.experimental import pallas as pl
from jax.experimental.pallas import tpu as pltpu


def _build_position_table(len_feature_input: int, max_len: int) -> jnp.ndarray:
    """Replicates the torch __init__ construction of self.P; returns (max_len, D) f32."""
    d = len_feature_input
    pos = jnp.arange(0, max_len, dtype=jnp.float32).reshape(-1, 1)          # (max_len, 1)
    div = jnp.power(10000.0, jnp.arange(0, d, 2, dtype=jnp.float32) / d)    # (ceil(D/2),)
    x = pos / div                                                            # (max_len, ceil(D/2))
    p = jnp.zeros((max_len, d), dtype=jnp.float32)
    p = p.at[:, 0::2].set(jnp.sin(x))
    if d % 2 == 0:
        p = p.at[:, 1::2].set(jnp.cos(x))
    else:
        p = p.at[:, 1::2].set(jnp.cos(x[:, :-1]))
    return p


def _pos_enc_kernel(seed_ref, x_ref, p_ref, o_ref, *,
                    row_block: int, col_block: int, total_cols: int,
                    dropout_threshold: int, keep_scale: float,
                    apply_dropout: bool):
    # x_ref block: (row_block, col_block); p_ref block: (1, col_block) -> broadcast add.
    y = x_ref[...] + p_ref[...]

    if apply_dropout:
        # Inverted dropout. Counter-based hash of the global element index mixed with
        # the seed: pure 32-bit VPU ops, deterministic per seed, independent per element.
        # TODO(synk): not bit-identical to torch.nn.Dropout's RNG stream.
        j = pl.program_id(0)   # column-tile axis (outer)
        i = pl.program_id(1)   # row-tile axis (inner)
        rows, cols = y.shape
        gr = jax.lax.broadcasted_iota(jnp.int32, (rows, cols), 0) + i * row_block
        gc = jax.lax.broadcasted_iota(jnp.int32, (rows, cols), 1) + j * col_block
        h = gr.astype(jnp.uint32) * jnp.uint32(total_cols) + gc.astype(jnp.uint32)
        h = h ^ seed_ref[0].astype(jnp.uint32)
        # murmur3-style finalizer (well-mixed uint32 hash)
        h = h ^ (h >> 16)
        h = h * jnp.uint32(0x85EBCA6B)
        h = h ^ (h >> 13)
        h = h * jnp.uint32(0xC2B2AE35)
        h = h ^ (h >> 16)
        keep = h >= jnp.uint32(dropout_threshold)          # P(keep) = 1 - rate
        y = jnp.where(keep, y * keep_scale, jnp.zeros_like(y))

    o_ref[...] = y.astype(o_ref.dtype)


def _pick_blocks(rows: int, cols: int, itemsize: int,
                 target_bytes: int = 2 * 1024 * 1024):
    """Pick (row_block, col_block): lane-dense last dim, ~target_bytes per block."""
    if cols * itemsize <= target_bytes or cols % 128 != 0:
        cb = cols
    else:
        cb = max(128, (target_bytes // itemsize // 128) * 128)
        cb = min(cb, cols)
        while cols % cb != 0 and cb > 128:
            cb -= 128
    rb = max(1, int(target_bytes // (cb * itemsize)))
    if rb >= rows:
        rb = rows
    elif rows >= 8:
        rb = max(8, (rb // 8) * 8)
    else:
        rb = rows
    return rb, cb


def positional_encoding_forward(x: jnp.ndarray,
                                p_table: jnp.ndarray,
                                *,
                                dropout_rate: float = 0.0,
                                training: bool = False,
                                seed: int = 0) -> jnp.ndarray:
    """Forward pass of PositionalEncoding.  x: (B, T, D); p_table: (max_len, D)."""
    b, t, d = x.shape
    rate = float(dropout_rate)
    apply_dropout = bool(training) and rate > 0.0
    if apply_dropout and rate >= 1.0:
        # torch.nn.Dropout(p=1.0) zeroes everything; avoid 1/(1-rate) in-kernel.
        return jnp.zeros_like(x)

    # Lane-dense 2D layout: rows = batch, cols = T*D.
    c = t * d
    x2 = x.reshape(b, c)
    p2 = p_table[:t, :].astype(x.dtype).reshape(1, c)   # cast once; add in x.dtype
    seed_arr = jnp.array([seed], dtype=jnp.int32)

    rb, cb = _pick_blocks(b, c, x.dtype.itemsize)
    grid = (pl.cdiv(c, cb), pl.cdiv(b, rb))   # col-tile axis outer -> p stays resident

    thr = min(max(int(round(rate * 2.0 ** 32)), 0), 2 ** 32 - 1)
    scale = 1.0 / (1.0 - rate) if apply_dropout else 1.0

    kernel = functools.partial(
        _pos_enc_kernel,
        row_block=rb, col_block=cb, total_cols=c,
        dropout_threshold=thr, keep_scale=scale, apply_dropout=apply_dropout)

    grid_spec = pltpu.PrefetchScalarGridSpec(
        num_scalar_prefetch=1,               # seed lands in SMEM
        grid=grid,
        in_specs=[
            pl.BlockSpec((rb, cb), lambda j, i, s: (i, j)),   # x tile
            pl.BlockSpec((1, cb), lambda j, i, s: (0, j)),    # p row, resident per col-tile
        ],
        out_specs=pl.BlockSpec((rb, cb), lambda j, i, s: (i, j)),
    )

    out2 = pl.pallas_call(
        kernel,
        out_shape=jax.ShapeDtypeStruct((b, c), x.dtype),
        grid_spec=grid_spec,
        compiler_params=pltpu.CompilerParams(
            dimension_semantics=("parallel", "parallel"),
            vmem_limit_bytes=32 * 1024 * 1024,
        ),
    )(seed_arr, x2, p2)
    return out2.reshape(b, t, d)


if __name__ == "__main__":
    # Small shapes consistent with the module: batch=2, seq=8, feature=32.
    B, T, D = 2, 8, 32
    MAX_LEN = 1000
    DROPOUT = 0.1

    key = jax.random.PRNGKey(0)
    x = jax.random.normal(key, (B, T, D), dtype=jnp.float32)
    p_table = _build_position_table(D, MAX_LEN)

    # Eval mode (dropout is identity) -> deterministic, check against pure-JAX ref.
    out = positional_encoding_forward(x, p_table, dropout_rate=DROPOUT, training=False)
    out = jax.block_until_ready(out)
    ref = x + p_table[None, :T, :]
    assert out.shape == (B, T, D)
    assert jnp.allclose(out, ref, atol=1e-6, rtol=1e-6)

    # Training mode: exercise the in-kernel dropout path.
    out_train = positional_encoding_forward(x, p_table, dropout_rate=DROPOUT,
                                            training=True, seed=42)
    out_train = jax.block_until_ready(out_train)
    assert out_train.shape == (B, T, D)
    scale = 1.0 / (1.0 - DROPOUT)
    is_zero = out_train == 0
    is_scaled = jnp.isclose(out_train, ref * scale, atol=1e-5, rtol=1e-5)
    assert bool(jnp.all(is_zero | is_scaled))
    keep_frac = float(jnp.mean((~is_zero).astype(jnp.float32)))
    assert 0.75 < keep_frac < 0.99, keep_frac

    print("KERNEL_OK")
</pallas_src>

<mosaic_0001>
module attributes {stable_mosaic.version = 11 : i64} {
  func.func @_pos_enc_kernel(%arg0: i32, %arg1: i32, %arg2: memref<1xi32, #tpu.memory_space<smem>>, %arg3: memref<2x256xf32, #tpu.memory_space<vmem>>, %arg4: memref<1x256xf32, #tpu.memory_space<vmem>>, %arg5: memref<2x256xf32, #tpu.memory_space<vmem>>) attributes {dimension_semantics = [#tpu.dimension_semantics<parallel>, #tpu.dimension_semantics<parallel>], iteration_bounds = array<i64: 1, 1>, scalar_prefetch = 1 : i64, scratch_operands = 0 : i64, tpu.core_type = #tpu.core_type<tc>, window_params = [{transform_indices = @transform_0, window_bounds = array<i64: 2, 256>}, {transform_indices = @transform_1, window_bounds = array<i64: 1, 256>}, {transform_indices = @transform_2, window_bounds = array<i64: 2, 256>}]} {
    %c0 = arith.constant 0 : index
    %c0_0 = arith.constant 0 : index
    %0 = vector.load %arg3[%c0, %c0_0] : memref<2x256xf32, #tpu.memory_space<vmem>>, vector<2x256xf32>
    %c0_1 = arith.constant 0 : index
    %c0_2 = arith.constant 0 : index
    %1 = vector.load %arg4[%c0_1, %c0_2] : memref<1x256xf32, #tpu.memory_space<vmem>>, vector<1x256xf32>
    %2 = vector.broadcast %1 : vector<1x256xf32> to vector<2x256xf32>
    %3 = arith.addf %0, %2 : vector<2x256xf32>
    %c0_3 = arith.constant 0 : index
    %c0_4 = arith.constant 0 : index
    %4 = vector.load %arg5[%c0_3, %c0_4] : memref<2x256xf32, #tpu.memory_space<vmem>>, vector<2x256xf32>
    tpu.vector_store %arg5[%c0_3, %c0_4], %3 {strides = array<i32>} : memref<2x256xf32, #tpu.memory_space<vmem>>, vector<2x256xf32>,
    return
  }
  func.func @transform_0(%arg0: i32, %arg1: i32, %arg2: memref<1xi32, #tpu.memory_space<smem>>) -> (i32, i32) {
    %c0_i32 = arith.constant 0 : i32
    return %arg1, %arg0 : i32, i32
  }
  func.func @transform_1(%arg0: i32, %arg1: i32, %arg2: memref<1xi32, #tpu.memory_space<smem>>) -> (i32, i32) {
    %c0_i32 = arith.constant 0 : i32
    %c0_i32_0 = arith.constant 0 : i32
    return %c0_i32, %arg0 : i32, i32
  }
  func.func @transform_2(%arg0: i32, %arg1: i32, %arg2: memref<1xi32, #tpu.memory_space<smem>>) -> (i32, i32) {
    %c0_i32 = arith.constant 0 : i32
    return %arg1, %arg0 : i32, i32
  }
}

</mosaic_0001>

<bundles_post_ra>
// kernel: tpu_custom_call.1
= control target key start
LH: loop header
LB: loop body
LE: loop exit
PB: predicated region body
PF: predicated region fallthrough
CT: control target
= control target key end

     0   :  { %9 = vsyncpa [#allocation5], 0  ;;  %s164_s0 = inlined_call_operand.<no memory space> [shape: s32[1], index: 0, kind: input, shape index: {}]   ;;  %s165_s1 = inlined_call_operand.hbm [shape: f32[2,256], index: 1, kind: input, shape index: {}]   ;;  %s166_s2 = inlined_call_operand.vmem [shape: f32[1,256], index: 2, kind: input, shape index: {}]   ;;  %s167_s3 = inlined_call_operand.hbm [shape: f32[2,256], index: 3, kind: output, shape index: {}]  }
   0x1   :  { %10 = vsyncpa [#allocation6], 0  ;;  %s114_s12 = smov [#allocation4]   ;;  %s66_s16 = scalar_lea.hbm %s165_s1, 64 }
   0x2   :  { %s17_s13 = sshll.u32 %s114_s12, 4  ;;  %p67_p0 = scmp.ne.s32.totalorder %s165_s1, %s66_s16  ;;  %s18_s13 = int_to_ptr.vmem [resolvable:$true] %s17_s13 }
   0x3   :  { %p70_p1 = scmp.lt.u32.totalorder %s66_s16, %s165_s1 }
   0x5   :  { %p72_p2 = pnand %p70_p1, %p67_p0 }
   0x7   :  { %75 = shalt.err (!%p72_p2)
}
   0x8   :  { %s76_s20 = scalar_lea.vmem %s18_s13, 64  ;;  %p81_p4 = scmp.lt.s32.totalorder %s18_s13, %s18_s13 }
   0x9   :  { %p77_p3 = scmp.ne.s32.totalorder %s18_s13, %s76_s20  ;;  %p82_p5 = scmp.lt.s32.totalorder %s76_s20, %s76_s20 }
   0xb   :  { %p83_p6 = por %p82_p5, %p81_p4 }
   0xd   :  { %p84_p7 = pnand %p83_p6, %p77_p3 }
   0xf   :  { %87 = shalt.err (!%p84_p7)
}
  0x10   :  { %20 = dma.hbm_to_vmem [thread:$0]  %s165_s1, 64, %s18_s13, [#allocation5]  }
  0x11   :  { %110 = dma.done.wait [#allocation5], 64  }
  0x12   :  { %111 = vsyncadd [#allocation5], 4294967232  ;;  %v29_v0 = vlaneseq  ;;  %v115_v1 = vmov 1983009808   ;;  %v27_v7 = vld [vmem:[%s166_s2] sm:$0x3] }
  0x13   :  { %v39_v2 = vunpack.c.l.s4 %v115_v1  ;;  %v26_v12 = vld [vmem:[#allocation4] sm:$0xf]  ;;  %s116_s25 = smov [#allocation7]  }
  0x14   :  { %v30_v3 = vshrl.u32 %v29_v0, 7  ;;  %s54_s1 = sshll.u32 %s116_s25, 4  ;;  %s55_s1 = int_to_ptr.vmem [resolvable:$true] %s54_s1 }
  0x15   :  { %v40_v6 = vunpack.c.0.s8 %v39_v2  ;;  %s88_s26 = scalar_lea.vmem %s55_s1, 64  ;;  %p93_p9 = scmp.lt.s32.totalorder %s55_s1, %s55_s1 }
  0x16   :  { %v31_v4 = vsub.s32 0, %v30_v3  ;;  %v35_v5 = vsub.s32 1, %v30_v3  ;;  %p89_p8 = scmp.ne.s32.totalorder %s55_s1, %s88_s26  ;;  %p94_p10 = scmp.lt.s32.totalorder %s88_s26, %s88_s26 }
  0x17   :  { %v43_v10 = vsub.s32 %v40_v6, %v30_v3 }
  0x18   :  { %v32_v8 = vrot.slane %v27_v7, %v31_v4  ;;  %v36_v9 = vrot.slane %v27_v7, %v35_v5  ;;  %p95_p11 = por %p94_p10, %p93_p9 }
  0x1a   :  { %v37_v11 = vcombine.low %v32_v8, %v36_v9  ;;  %p96_p12 = pnand %p95_p11, %p89_p8 }
  0x1c   :  { %v44_v13 = vrot.slane %v37_v11, %v43_v10 }
  0x1e   :  { %v46_v14 = vadd.f32 %v44_v13, %v26_v12 }
  0x20   :  { %47 = vst [vmem:[#allocation7] sm:$0xf] %v46_v14 }
  0x21   :  { %99 = shalt.err (!%p96_p12)
}
  0x22   :  { %s100_s28 = scalar_lea.hbm %s167_s3, 64 }
  0x23   :  { %p101_p13 = scmp.ne.s32.totalorder %s167_s3, %s100_s28  ;;  %p104_p0 = scmp.lt.u32.totalorder %s100_s28, %s167_s3 }
  0x25   :  { %p106_p1 = pnand %p104_p0, %p101_p13 }
  0x27   :  { %109 = shalt.err (!%p106_p1)
}
  0x28   :  { %57 = dma.vmem_to_hbm [thread:$0]  %s55_s1, 64, %s167_s3, [#allocation6]  }
  0x29   :  { %112 = dma.done.wait [#allocation6], 64  }
  0x2a   :  { %113 = vsyncadd [#allocation6], 4294967232 }
  0x2b   :  { %61 = vsyncpa [#allocation5], 1 }
  0x2c   :  { %62 = vsyncpa [#allocation6], 1 }

</bundles_post_ra>
